<compile_context>
chip_gen: v6e
topology: v6e:2x2x1
jax: 0.10.0
libtpu: 0.0.40
codegen_flags: <defaults>
</compile_context>

<pallas_src>
import jax
import jax.numpy as jnp
from jax.experimental import pallas as pl
from jax.experimental.pallas import tpu as pltpu

_EPS = 1e-8
_LANES = 384            # 128 three-vectors per lane-dense row
_TM_MAX = 2048          # max row tile: 2048 * 384 * 4 B = 3 MiB per f32 block
_VMEM_LIMIT = 48 << 20  # in/out double-buffered (~12 MiB @ tm=2048) + roll temps


def _vector_scaling_kernel(x_ref, o_ref):
    x = x_ref[...].astype(jnp.float32)                       # (tm, 384)
    sq = x * x

    # Left+right neighbour sum of every lane: the two opposite unit rotations
    # cover both neighbours irrespective of roll direction (XLU work).
    nbr = pltpu.roll(sq, 1, axis=1) + pltpu.roll(sq, _LANES - 1, axis=1)

    # Hoisted middle-lane mask, (1, 384); the select broadcasts it over rows.
    lane = jax.lax.broadcasted_iota(jnp.int32, (1, _LANES), 1)
    is_mid = (lane % 3) == 1

    # At the middle lane of each 3-group, sq + nbr == group sum of squares.
    z = jnp.sqrt(sq + nbr + _EPS)
    sig = 0.5 * jnp.tanh(0.5 * z) + 0.5                       # sigmoid, 1 EUP op
    s_mid = jnp.where(is_mid, sig, 0.0)

    # Broadcast the per-group scale from the middle lane to its neighbours
    # (the "wrong" direction lands on a zeroed non-middle lane -> harmless).
    scale = (s_mid
             + pltpu.roll(s_mid, 1, axis=1)
             + pltpu.roll(s_mid, _LANES - 1, axis=1))

    o_ref[...] = (scale * x).astype(o_ref.dtype)


def _scale_jnp(x):
    """Plain-jnp VectorScaling (used for the <128-vector tail / tiny inputs)."""
    xf = x.astype(jnp.float32)
    norm = jnp.sqrt(jnp.sum(xf * xf, axis=-1, keepdims=True) + _EPS)
    return (jax.nn.sigmoid(norm) * xf).astype(x.dtype)


def _choose_tile(rows):
    """Row tile: full extent for tiny inputs, otherwise a multiple of 8 sized
    so the grid has >= 2 roughly equal steps (v7x has 2 TensorCores and the
    'parallel' axis shards across them), capped at _TM_MAX to fit VMEM."""
    if rows <= 8:
        return rows
    half = ((rows + 1) // 2 + 7) // 8 * 8
    return min(_TM_MAX, half)


def _bulk_call(x2d):
    rows = x2d.shape[0]
    tm = _choose_tile(rows)
    grid = pl.cdiv(rows, tm)
    n_bulk = rows * _LANES
    itemsize = jnp.dtype(x2d.dtype).itemsize
    return pl.pallas_call(
        _vector_scaling_kernel,
        out_shape=jax.ShapeDtypeStruct((rows, _LANES), x2d.dtype),
        grid_spec=pltpu.PrefetchScalarGridSpec(
            num_scalar_prefetch=0,
            grid=(grid,),
            in_specs=[pl.BlockSpec((tm, _LANES), lambda i: (i, 0))],
            out_specs=pl.BlockSpec((tm, _LANES), lambda i: (i, 0)),
        ),
        compiler_params=pltpu.CompilerParams(
            dimension_semantics=("parallel",),
            vmem_limit_bytes=_VMEM_LIMIT,
        ),
        cost_estimate=pl.CostEstimate(
            flops=12 * n_bulk,
            transcendentals=2 * n_bulk,
            bytes_accessed=2 * n_bulk * itemsize,
        ),
    )(x2d)


def vector_scaling(x):
    """x: (*, n_dims, 3) -> same shape, s * x with s = sigmoid(safe_norm(x))."""
    orig_shape = x.shape
    assert orig_shape[-1] == 3, "last axis must be the 3-vector axis"

    n = x.size
    n_vec = n // 3
    rows = n_vec // 128          # full lane-dense rows
    n_bulk = rows * _LANES

    if rows == 0:
        # Fewer than 128 vectors: not worth a kernel launch.
        return _scale_jnp(x)

    x_flat = x.reshape(-1)       # free for contiguous input

    if n_bulk == n:
        # Exactly one HBM read + one HBM write.
        out2d = _bulk_call(x_flat.reshape(rows, _LANES))
        return out2d.reshape(orig_shape)

    # Bulk through the kernel; the <= 383-element tail in plain jnp (no
    # whole-tensor pad / post-slice passes).
    bulk = x_flat[:n_bulk].reshape(rows, _LANES)
    tail = x_flat[n_bulk:].reshape(-1, 3)
    out_bulk = _bulk_call(bulk).reshape(-1)
    out_tail = _scale_jnp(tail).reshape(-1)
    return jnp.concatenate([out_bulk, out_tail]).reshape(orig_shape)


def _reference(x):
    xf = x.astype(jnp.float32)
    norm = jnp.sqrt(jnp.sum(xf * xf, axis=-1, keepdims=True) + _EPS)
    return (jax.nn.sigmoid(norm) * xf).astype(x.dtype)


if __name__ == "__main__":
    fn = jax.jit(vector_scaling)
    key = jax.random.PRNGKey(0)

    # Case 1: kernel bulk + jnp tail (400 vectors = 3 lane-dense rows + 16 tail).
    x1 = jax.random.normal(key, (2, 200, 3), dtype=jnp.float32)
    o1 = jax.block_until_ready(fn(x1))
    assert o1.shape == x1.shape and o1.dtype == x1.dtype
    assert jnp.allclose(o1, _reference(x1), atol=1e-5, rtol=1e-5)

    # Case 2: exact multiple of 384 elements (kernel only, no tail).
    x2 = jax.random.normal(jax.random.PRNGKey(1), (4, 96, 3), dtype=jnp.float32)
    o2 = jax.block_until_ready(fn(x2))
    assert o2.shape == x2.shape and o2.dtype == x2.dtype
    assert jnp.allclose(o2, _reference(x2), atol=1e-5, rtol=1e-5)

    # Case 3: multi-step grid (4096 vectors -> 32 rows -> 2 grid steps).
    x3 = jax.random.normal(jax.random.PRNGKey(2), (2, 2048, 3), dtype=jnp.float32)
    o3 = jax.block_until_ready(fn(x3))
    assert o3.shape == x3.shape and o3.dtype == x3.dtype
    assert jnp.allclose(o3, _reference(x3), atol=1e-5, rtol=1e-5)

    # Case 4: tiny input (<128 vectors) -> pure-jnp fallback path.
    x4 = jax.random.normal(jax.random.PRNGKey(3), (2, 16, 3), dtype=jnp.float32)
    o4 = jax.block_until_ready(fn(x4))
    assert o4.shape == x4.shape and o4.dtype == x4.dtype
    assert jnp.allclose(o4, _reference(x4), atol=1e-5, rtol=1e-5)

    print("KERNEL_OK")
</pallas_src>

<mosaic_0001>
module attributes {stable_mosaic.version = 11 : i64} {
  func.func @_vector_scaling_kernel(%arg0: i32, %arg1: memref<3x384xf32, #tpu.memory_space<vmem>>, %arg2: memref<3x384xf32, #tpu.memory_space<vmem>>) attributes {dimension_semantics = [#tpu.dimension_semantics<parallel>], iteration_bounds = array<i64: 1>, scalar_prefetch = 0 : i64, scratch_operands = 0 : i64, tpu.core_type = #tpu.core_type<tc>, window_params = [{transform_indices = @transform_0, window_bounds = array<i64: 3, 384>}, {transform_indices = @transform_1, window_bounds = array<i64: 3, 384>}]} {
    %c0 = arith.constant 0 : index
    %c0_0 = arith.constant 0 : index
    %0 = vector.load %arg1[%c0, %c0_0] : memref<3x384xf32, #tpu.memory_space<vmem>>, vector<3x384xf32>
    %1 = arith.mulf %0, %0 : vector<3x384xf32>
    %c1_i32 = arith.constant 1 : i32
    %2 = tpu.dynamic_rotate %1 by %c1_i32 dim 1 : vector<3x384xf32>, i32 -> vector<3x384xf32>
    %c383_i32 = arith.constant 383 : i32
    %3 = tpu.dynamic_rotate %1 by %c383_i32 dim 1 : vector<3x384xf32>, i32 -> vector<3x384xf32>
    %4 = arith.addf %2, %3 : vector<3x384xf32>
    %5 = tpu.iota {dimensions = array<i32: 1>} : vector<1x384xi32>
    %c3_i32 = arith.constant 3 : i32
    %c0_i32 = arith.constant 0 : i32
    %6 = arith.cmpi eq, %c3_i32, %c0_i32 : i32
    %c1_i32_1 = arith.constant 1 : i32
    %7 = arith.select %6, %c1_i32_1, %c3_i32 : i32
    %8 = vector.broadcast %7 : i32 to vector<1x384xi32>
    %9 = arith.remsi %5, %8 : vector<1x384xi32>
    %c0_i32_2 = arith.constant 0 : i32
    %10 = vector.broadcast %c0_i32_2 : i32 to vector<1x384xi32>
    %11 = arith.cmpi ne, %9, %10 : vector<1x384xi32>
    %c0_i32_3 = arith.constant 0 : i32
    %12 = vector.broadcast %c0_i32_3 : i32 to vector<1x384xi32>
    %13 = arith.cmpi slt, %9, %12 : vector<1x384xi32>
    %c0_i32_4 = arith.constant 0 : i32
    %14 = arith.cmpi slt, %7, %c0_i32_4 : i32
    %15 = vector.broadcast %14 : i1 to vector<1x384xi1>
    %16 = vector.broadcast %15 : vector<1x384xi1> to vector<1x384xi1>
    %17 = arith.xori %13, %16 : vector<1x384xi1>
    %18 = arith.andi %17, %11 : vector<1x384xi1>
    %19 = vector.broadcast %7 : i32 to vector<1x384xi32>
    %20 = arith.addi %9, %19 : vector<1x384xi32>
    %21 = arith.select %18, %20, %9 : vector<1x384xi1>, vector<1x384xi32>
    %c1_i32_5 = arith.constant 1 : i32
    %22 = vector.broadcast %c1_i32_5 : i32 to vector<1x384xi32>
    %23 = arith.cmpi eq, %21, %22 : vector<1x384xi32>
    %24 = arith.addf %1, %4 : vector<3x384xf32>
    %cst = arith.constant 9.99999993E-9 : f32
    %25 = vector.broadcast %cst : f32 to vector<3x384xf32>
    %26 = arith.addf %24, %25 : vector<3x384xf32>
    %27 = math.sqrt %26 : vector<3x384xf32>
    %cst_6 = arith.constant 5.000000e-01 : f32
    %28 = vector.broadcast %cst_6 : f32 to vector<3x384xf32>
    %29 = arith.mulf %28, %27 : vector<3x384xf32>
    %30 = math.tanh %29 : vector<3x384xf32>
    %cst_7 = arith.constant 5.000000e-01 : f32
    %31 = vector.broadcast %cst_7 : f32 to vector<3x384xf32>
    %32 = arith.mulf %31, %30 : vector<3x384xf32>
    %cst_8 = arith.constant 5.000000e-01 : f32
    %33 = vector.broadcast %cst_8 : f32 to vector<3x384xf32>
    %34 = arith.addf %32, %33 : vector<3x384xf32>
    %cst_9 = arith.constant 0.000000e+00 : f32
    %35 = vector.shape_cast %23 : vector<1x384xi1> to vector<1x384xi1>
    %36 = vector.broadcast %35 : vector<1x384xi1> to vector<3x384xi1>
    %37 = vector.broadcast %cst_9 : f32 to vector<3x384xf32>
    %38 = arith.select %36, %34, %37 : vector<3x384xi1>, vector<3x384xf32>
    %c1_i32_10 = arith.constant 1 : i32
    %39 = tpu.dynamic_rotate %38 by %c1_i32_10 dim 1 : vector<3x384xf32>, i32 -> vector<3x384xf32>
    %40 = arith.addf %38, %39 : vector<3x384xf32>
    %c383_i32_11 = arith.constant 383 : i32
    %41 = tpu.dynamic_rotate %38 by %c383_i32_11 dim 1 : vector<3x384xf32>, i32 -> vector<3x384xf32>
    %42 = arith.addf %40, %41 : vector<3x384xf32>
    %43 = arith.mulf %42, %0 : vector<3x384xf32>
    %c0_12 = arith.constant 0 : index
    %c0_13 = arith.constant 0 : index
    %44 = vector.load %arg2[%c0_12, %c0_13] : memref<3x384xf32, #tpu.memory_space<vmem>>, vector<3x384xf32>
    tpu.vector_store %arg2[%c0_12, %c0_13], %43 {strides = array<i32>} : memref<3x384xf32, #tpu.memory_space<vmem>>, vector<3x384xf32>,
    return
  }
  func.func @transform_0(%arg0: i32) -> (i32, i32) {
    %c0_i32 = arith.constant 0 : i32
    %c0_i32_0 = arith.constant 0 : i32
    return %arg0, %c0_i32 : i32, i32
  }
  func.func @transform_1(%arg0: i32) -> (i32, i32) {
    %c0_i32 = arith.constant 0 : i32
    %c0_i32_0 = arith.constant 0 : i32
    return %arg0, %c0_i32 : i32, i32
  }
}

</mosaic_0001>

<bundles_post_ra>
// kernel: vector_scaling.1
= control target key start
LH: loop header
LB: loop body
LE: loop exit
PB: predicated region body
PF: predicated region fallthrough
CT: control target
= control target key end

     0   :  { %s192_s10 = smov 1   ;;  %s193_s11 = smov 127   ;;  %v21_v5 = vlaneseq  ;;  %s284_s0 = inlined_call_operand.vmem [shape: f32[3,384], index: 0, kind: input, shape index: {}]   ;;  %s285_s1 = inlined_call_operand.vmem [shape: f32[3,384], index: 1, kind: output, shape index: {}]  }
   0x1   :  { %v207_v0 = vld [vmem:[%s284_s0 + $0x8] sm:$0x7]  ;;  %v212_v1 = vld [vmem:[%s284_s0] sm:$0x77] }
   0x2   :  { %v11_v2 = vmul.f32 %v207_v0, %v207_v0  ;;  %v10_v3 = vmul.f32 %v212_v1, %v212_v1  ;;  %v224_v8 = vand.u32 127, %v21_v5 }
   0x4   :  { %19 = vrot.lane.b32.xlu1 %v11_v2, %s192_s10  ;;  %15 = vrot.lane.b32.xlu0 %v10_v3, %s192_s10  ;;  %v13_v4 = vcombine.high %v10_v3, %v10_v3  ;;  %vm23_vm0 = vcmp.lt.s32.totalorder %v224_v8, 1  ;;  %vm33_vm1 = vcmp.lt.s32.totalorder %v224_v8, 127  ;;  %v41_v27 = vadd.s32 256, %v224_v8 }
   0x5   :  { %v245_v30 = vmul.u32.u64.low 2863311531, %v224_v8  ;;  %v246_v31 = vmul.u32.u64.high 2863311531, %v224_v8, %v245_v30  ;;  %v40_v32 = vadd.s32 128, %v224_v8 }
   0x6   :  { %v241_v28 = vmul.u32.u64.low 2863311531, %v41_v27  ;;  %v242_v29 = vmul.u32.u64.high 2863311531, %v41_v27, %v241_v28 }
   0x7   :  { %v249_v33 = vmul.u32.u64.low 2863311531, %v40_v32  ;;  %v250_v34 = vmul.u32.u64.high 2863311531, %v40_v32, %v249_v33  ;;  %v48_v41 = vshrl.u32 %v246_v31, 1 }
   0x8   :  { %27 = vrot.lane.b32.xlu1 %v10_v3, %s193_s11  ;;  %17 = vrot.lane.b32.xlu0 %v13_v4, %s192_s10  ;;  %v70_v36 = vshrl.u32 %v242_v29, 1 }
   0x9   :  { %v49_v49 = vmul.u32 3, %v48_v41  ;;  %v59_v51 = vshrl.u32 %v250_v34, 1 }
   0xa   :  { %v71_v45 = vmul.u32 3, %v70_v36 }
   0xb   :  { %v50_v53 = vsub.s32 %v224_v8, %v49_v49  ;;  %v60_v54 = vmul.u32 3, %v59_v51 }
   0xc   :  { %31 = vrot.lane.b32.xlu1 %v11_v2, %s193_s11  ;;  %29 = vrot.lane.b32.xlu0 %v13_v4, %s193_s11  ;;  %v72_v52 = vsub.s32 %v41_v27, %v71_v45 }
   0xd   :  { %vm75_vm8 = vcmp.ne.s32.totalorder %v50_v53, 0  ;;  %vm78_vm9 = vcmp.lt.s32.totalorder %v50_v53, 0  ;;  %v61_v56 = vsub.s32 %v40_v32, %v60_v54  ;;  %v84_v57 = vadd.s32 3, %v50_v53 }
   0xe   :  { %vm77_vm6 = vcmp.ne.s32.totalorder %v72_v52, 0  ;;  %vm80_vm7 = vcmp.lt.s32.totalorder %v72_v52, 0  ;;  %v86_v55 = vadd.s32 3, %v72_v52  ;;  %vm81_vm11 = vmand %vm78_vm9, %vm75_vm8 }
   0xf   :  { %vm83_vm10 = vmand %vm80_vm7, %vm77_vm6  ;;  %vm76_vm12 = vcmp.ne.s32.totalorder %v61_v56, 0  ;;  %vm79_vm13 = vcmp.lt.s32.totalorder %v61_v56, 0  ;;  %v87_v61 = vsel %vm81_vm11, %v84_v57, %v50_v53  ;;  %v85_v62 = vadd.s32 3, %v61_v56 }
  0x10   :  { %v89_v58 = vsel %vm83_vm10, %v86_v55, %v72_v52  ;;  %vm82_vm15 = vmand %vm79_vm13, %vm76_vm12 }
  0x11   :  { %vm92_vm14 = vcmp.eq.s32.totalorder %v89_v58, 1 }
  0x76   :  { %v20_v6 = vpop.permute.xlu1 %19  ;;  %v16_v7 = vpop.permute.xlu0 %15 }
  0x77   :  { %v26_v11 = vsel %vm23_vm0, %v20_v6, %v16_v7 }
  0x7a   :  { %v28_v9 = vpop.permute.xlu1 %27  ;;  %v18_v10 = vpop.permute.xlu0 %17 }
  0x7b   :  { %v24_v12 = vsel %vm23_vm0, %v18_v10, %v20_v6  ;;  %v25_v15 = vsel %vm23_vm0, %v16_v7, %v18_v10  ;;  %v88_v6 = vsel %vm82_vm15, %v85_v62, %v61_v56 }
  0x7e   :  { %v32_v13 = vpop.permute.xlu1 %31  ;;  %v30_v14 = vpop.permute.xlu0 %29 }
  0x7f   :  { %v36_v16 = vsel %vm33_vm1, %v32_v13, %v28_v9  ;;  %v34_v17 = vsel %vm33_vm1, %v30_v14, %v32_v13  ;;  %v35_v18 = vsel %vm33_vm1, %v28_v9, %v30_v14 }
  0x80   :  { %v39_v19 = vadd.f32 %v36_v16, %v24_v12  ;;  %v37_v20 = vadd.f32 %v35_v18, %v26_v11  ;;  %v38_v21 = vadd.f32 %v34_v17, %v25_v15 }
  0x82   :  { %v98_v22 = vadd.f32 %v39_v19, %v11_v2  ;;  %v95_v23 = vcombine.low %v37_v20, %v38_v21 }
  0x84   :  { %v100_v24 = vadd.f32 1e-08, %v98_v22  ;;  %v97_v25 = vadd.f32 %v95_v23, %v10_v3 }
  0x86   :  { %184 = vrsqrt.f32 %v100_v24  ;;  %v99_v26 = vadd.f32 1e-08, %v97_v25  ;;  %vm110_vm2 = vcmp.eq.f32.partialorder %v100_v24, inf  ;;  %v113_v39 = vand.u32 2147483648, %v100_v24 }
  0x87   :  { %vm112_vm3 = vcmp.eq.f32.partialorder %v100_v24, 0.0 }
  0x88   :  { %186 = vrsqrt.f32 %v99_v26  ;;  %vm103_vm4 = vcmp.eq.f32.partialorder %v99_v26, inf  ;;  %v106_v44 = vand.u32 2147483648, %v99_v26  ;;  %vm105_vm5 = vcmp.eq.f32.partialorder %v99_v26, 0.0 }
  0x93   :  { %v185_v35 = vpop.eup %184 }
  0x94   :  { %v109_v37 = vmul.f32 %v185_v35, %v100_v24 }
  0x95   :  { %v187_v38 = vpop.eup %186 }
  0x96   :  { %v111_v40 = vsel %vm110_vm2, %v100_v24, %v109_v37  ;;  %v102_v42 = vmul.f32 %v187_v38, %v99_v26  ;;  %vm90_vm2 = vcmp.eq.s32.totalorder %v87_v61, 1  ;;  %v160_v24 = vcombine.high %v212_v1, %v212_v1 }
  0x97   :  { %v114_v43 = vsel %vm112_vm3, %v113_v39, %v111_v40  ;;  %vm91_vm3 = vcmp.eq.s32.totalorder %v88_v6, 1 }
  0x98   :  { %v116_v46 = vmul.f32 0.5, %v114_v43  ;;  %v104_v47 = vsel %vm103_vm4, %v99_v26, %v102_v42 }
  0x99   :  { %v107_v48 = vsel %vm105_vm5, %v106_v44, %v104_v47 }
  0x9a   :  { %188 = vtanh.f32 %v116_v46  ;;  %v115_v50 = vmul.f32 0.5, %v107_v48 }
  0x9c   :  { %190 = vtanh.f32 %v115_v50 }
  0xa7   :  { %v189_v59 = vpop.eup %188 }
  0xa8   :  { %v120_v60 = vmul.f32 0.5, %v189_v59 }
  0xa9   :  { %v191_v63 = vpop.eup %190 }
  0xaa   :  { %v122_v2 = vadd.f32 0.5, %v120_v60  ;;  %v119_v3 = vmul.f32 0.5, %v191_v63 }
  0xac   :  { %v134_v4 = vsel %vm92_vm14, %v122_v2, 0.0  ;;  %v121_v5 = vadd.f32 0.5, %v119_v3 }
  0xad   :  { %139 = vrot.lane.b32.xlu0 %v134_v4, %s192_s10 }
  0xae   :  { %v132_v7 = vsel %vm90_vm2, %v121_v5, 0.0  ;;  %v130_v9 = vcombine.high %v121_v5, %v121_v5 }
  0xaf   :  { %147 = vrot.lane.b32.xlu1 %v132_v7, %s193_s11 }
  0xb0   :  { %v133_v10 = vsel %vm91_vm3, %v130_v9, 0.0 }
  0xb1   :  { %135 = vrot.lane.b32.xlu0 %v132_v7, %s192_s10 }
  0xb3   :  { %137 = vrot.lane.b32.xlu1 %v133_v10, %s192_s10 }
  0xb5   :  { %149 = vrot.lane.b32.xlu0 %v133_v10, %s193_s11 }
  0xb7   :  { %151 = vrot.lane.b32.xlu1 %v134_v4, %s193_s11 }
 0x11f   :  { %v140_v11 = vpop.permute.xlu0 %139 }
 0x121   :  { %v148_v12 = vpop.permute.xlu1 %147 }
 0x123   :  { %v136_v13 = vpop.permute.xlu0 %135 }
 0x124   :  { %v143_v14 = vsel %vm23_vm0, %v140_v11, %v136_v13 }
 0x125   :  { %v138_v15 = vpop.permute.xlu1 %137  ;;  %v144_v18 = vadd.f32 %v143_v14, %v132_v7 }
 0x126   :  { %v141_v16 = vsel %vm23_vm0, %v138_v15, %v140_v11  ;;  %v142_v17 = vsel %vm23_vm0, %v136_v13, %v138_v15 }
 0x127   :  { %v150_v19 = vpop.permute.xlu0 %149  ;;  %v145_v21 = vadd.f32 %v142_v17, %v133_v10  ;;  %v146_v22 = vadd.f32 %v141_v16, %v134_v4 }
 0x128   :  { %v154_v20 = vsel %vm33_vm1, %v148_v12, %v150_v19 }
 0x129   :  { %v156_v23 = vadd.f32 %v154_v20, %v144_v18  ;;  %v152_v25 = vpop.permute.xlu1 %151 }
 0x12a   :  { %v153_v26 = vsel %vm33_vm1, %v150_v19, %v152_v25  ;;  %v155_v27 = vsel %vm33_vm1, %v152_v25, %v148_v12 }
 0x12b   :  { %v157_v28 = vadd.f32 %v153_v26, %v145_v21  ;;  %v158_v29 = vadd.f32 %v155_v27, %v146_v22  ;;  %v162_v30 = vmul.f32 %v156_v23, %v212_v1 }
 0x12d   :  { %v163_v31 = vmul.f32 %v160_v24, %v157_v28  ;;  %v164_v32 = vmul.f32 %v158_v29, %v207_v0 }
 0x12f   :  { %v167_v33 = vcombine.low %v162_v30, %v163_v31  ;;  %170 = vst [vmem:[%s285_s1 + $0x8] sm:$0x7] %v164_v32 }
 0x131   :  { %169 = vst [vmem:[%s285_s1] sm:$0x77] %v167_v33 }

</bundles_post_ra>
